<compile_context>
chip_gen: v7x
topology: tpu7x:2x2x1
jax: 0.10.0
libtpu: 0.0.40
codegen_flags: <defaults>
</compile_context>

<pallas_src>
import functools

import numpy as np
import jax
import jax.numpy as jnp
from jax.experimental import pallas as pl
from jax.experimental.pallas import tpu as pltpu


def _build_window_counts(L, kernel_size, stride, pad, out_len, dtype):
    """(out_len, L) matrix of integer window counts.

    counts[o, t] = number of taps of output window o that land on source row t
    after edge-replicate padding; each row sums to kernel_size.  Integer counts
    are exact in f32/bf16; the 1/k scale is applied in f32 inside the kernel.
    """
    p = np.arange(L + 2 * pad)
    src = np.clip(p - pad, 0, L - 1)                    # padded pos -> source row
    o = np.arange(out_len)[:, None]
    in_win = (p[None, :] >= o * stride) & (p[None, :] < o * stride + kernel_size)
    onehot = (src[:, None] == np.arange(L)[None, :])
    counts = in_win.astype(np.float64) @ onehot.astype(np.float64)
    return jnp.asarray(counts, dtype=dtype)


def _moving_avg_kernel(a_ref, x_ref, o_ref, *, inv_k):
    # a_ref: (out_len, L) counts; x_ref: (TB, L, tc); o_ref: (TB, out_len, tc)
    a = a_ref[...]
    for b in range(x_ref.shape[0]):          # TB is small & static -> unrolled
        acc = jnp.dot(a, x_ref[b],
                      preferred_element_type=jnp.float32,
                      precision=jax.lax.Precision.HIGHEST)
        o_ref[b] = (acc * inv_k).astype(o_ref.dtype)


def _vmem_budget():
    """(vmem_limit_bytes, usable_bytes_for_blocks), generation-aware."""
    try:
        cap = int(pltpu.get_tpu_info().vmem_capacity_bytes)
    except Exception:                         # interpret mode / older runtimes
        cap = 64 * 1024 * 1024
    vmem_limit = min(cap // 2, 64 * 1024 * 1024)   # 64 MiB v5e/v6e, 32 MiB v7x
    usable = (vmem_limit * 3) // 5                 # headroom for compiler scratch
    return vmem_limit, usable


def _pick_tiles(B, C, L, out_len, itemsize, a_bytes, usable, *,
                max_tb=16, min_steps=4):
    """Pick (TB, tc): big blocks (fewer per-step overheads, bigger DMAs) that
    fit the VMEM budget while keeping >= min_steps grid steps (megacore +
    double-buffering on v7x)."""
    if C % 128 == 0:
        lane_tiles = [t for t in range(128, C + 1, 128) if C % t == 0]
    else:
        lane_tiles = [C]                      # full-dim block (wrapper repacked C)
    batch_tiles = [t for t in range(1, min(B, max_tb) + 1) if B % t == 0]
    options = []
    for tc in lane_tiles:
        for tb in batch_tiles:
            blk = tb * (L + out_len) * tc * itemsize   # one in + one out block
            fits = 2 * blk + 2 * a_bytes <= usable     # x2: double-buffering
            steps = (B // tb) * (C // tc)
            options.append((fits, steps, blk, tb, tc))
    if not any(opt[0] for opt in options):
        # TODO(synk): tile the time axis (block-column counts + accumulation)
        # for sequences too long for a full (L + out_len) column to fit VMEM.
        return 1, min(lane_tiles)
    max_steps = max(opt[1] for opt in options if opt[0])
    target = min(min_steps, max_steps)
    best = max(options, key=lambda o: (o[0], o[1] >= target, o[2], o[4]))
    return best[3], best[4]


def _moving_avg_lane_dense(x, kernel_size, stride):
    """Core pallas_call; x: (B, L, C) with C already lane-friendly."""
    B, L, C = x.shape
    pad = (kernel_size - 1) // 2
    out_len = (L + 2 * pad - kernel_size) // stride + 1
    itemsize = jnp.dtype(x.dtype).itemsize
    a = _build_window_counts(L, kernel_size, stride, pad, out_len, x.dtype)
    a_bytes = out_len * L * itemsize
    vmem_limit, usable = _vmem_budget()
    tb, tc = _pick_tiles(B, C, L, out_len, itemsize, a_bytes, usable)

    kernel = functools.partial(_moving_avg_kernel, inv_k=1.0 / kernel_size)
    return pl.pallas_call(
        kernel,
        out_shape=jax.ShapeDtypeStruct((B, out_len, C), x.dtype),
        grid=(B // tb, C // tc),
        in_specs=[
            pl.BlockSpec((out_len, L), lambda b, c: (0, 0)),   # counts: DMA'd once
            pl.BlockSpec((tb, L, tc), lambda b, c: (b, 0, c)),
        ],
        out_specs=pl.BlockSpec((tb, out_len, tc), lambda b, c: (b, 0, c)),
        compiler_params=pltpu.CompilerParams(
            dimension_semantics=("parallel", "parallel"),
            vmem_limit_bytes=vmem_limit),
        cost_estimate=pl.CostEstimate(
            flops=2 * B * out_len * L * C,
            transcendentals=0,
            bytes_accessed=(B * (L + out_len) * C + out_len * L) * itemsize),
    )(a, x)


def moving_avg(x, kernel_size, stride=1):
    """Pallas implementation of MovingAvg.forward.  x: (B, L, C)."""
    assert kernel_size >= 1 and stride >= 1
    B, L, C = x.shape
    if C % 128 == 0:
        return _moving_avg_lane_dense(x, kernel_size, stride)
    # Small / unaligned channel count (typical DLinear, e.g. C=7): repack so
    # the lane axis is B*C (padded to a multiple of 128) -> unmasked,
    # lane-dense stores and a single VMEM-checked layout on all generations.
    N = B * C
    Np = ((N + 127) // 128) * 128
    x2 = jnp.transpose(x, (1, 0, 2)).reshape(L, N)
    if Np != N:
        x2 = jnp.pad(x2, ((0, 0), (0, Np - N)))
    out2 = _moving_avg_lane_dense(x2[None], kernel_size, stride)[0]
    out2 = out2[:, :N].reshape(-1, B, C)
    return jnp.transpose(out2, (1, 0, 2))


def _reference(x, kernel_size, stride):
    """Pure-JAX reference mirroring the PyTorch MovingAvg module."""
    pad = (kernel_size - 1) // 2
    front = jnp.repeat(x[:, 0:1, :], pad, axis=1)
    end = jnp.repeat(x[:, -1:, :], pad, axis=1)
    xp = jnp.concatenate([front, x, end], axis=1)
    Lp = xp.shape[1]
    L_out = (Lp - kernel_size) // stride + 1
    windows = jnp.stack(
        [xp[:, i * stride:i * stride + kernel_size, :] for i in range(L_out)],
        axis=1)                                    # (B, L_out, k, C)
    return jnp.mean(windows, axis=2)


if __name__ == "__main__":
    key = jax.random.PRNGKey(0)
    k1, k2 = jax.random.split(key)

    # Case 1: DLinear-typical tiny channel count -> lane-dense repack path.
    B, L, C, ks = 2, 16, 8, 5
    x = jax.random.normal(k1, (B, L, C), dtype=jnp.float32)
    out = moving_avg(x, kernel_size=ks, stride=1)
    jax.block_until_ready(out)
    ref = _reference(x, ks, 1)
    assert out.shape == ref.shape == (B, L, C)
    assert jnp.allclose(out, ref, atol=1e-4, rtol=1e-4)

    # Case 2: lane-aligned channels (C % 128 == 0), larger kernel_size.
    B2, L2, C2, ks2 = 2, 64, 256, 25
    x2 = jax.random.normal(k2, (B2, L2, C2), dtype=jnp.float32)
    out2 = moving_avg(x2, kernel_size=ks2, stride=1)
    jax.block_until_ready(out2)
    ref2 = _reference(x2, ks2, 1)
    assert out2.shape == ref2.shape == (B2, L2, C2)
    assert jnp.allclose(out2, ref2, atol=1e-4, rtol=1e-4)

    # Case 3: stride > 1 (general AvgPool1d behaviour, folded into the counts).
    out3 = moving_avg(x, kernel_size=ks, stride=2)
    jax.block_until_ready(out3)
    ref3 = _reference(x, ks, 2)
    assert out3.shape == ref3.shape
    assert jnp.allclose(out3, ref3, atol=1e-4, rtol=1e-4)

    print("KERNEL_OK")
</pallas_src>

<mosaic_0001>
module attributes {stable_mosaic.version = 11 : i64} {
  func.func @_moving_avg_kernel(%arg0: i32, %arg1: i32, %arg2: memref<16x16xf32, #tpu.memory_space<vmem>>, %arg3: memref<1x16x128xf32, #tpu.memory_space<vmem>>, %arg4: memref<1x16x128xf32, #tpu.memory_space<vmem>>) attributes {dimension_semantics = [#tpu.dimension_semantics<parallel>, #tpu.dimension_semantics<parallel>], iteration_bounds = array<i64: 1, 1>, scalar_prefetch = 0 : i64, scratch_operands = 0 : i64, tpu.core_type = #tpu.core_type<tc>, window_params = [{pipeline_mode = #tpu.pipeline_mode<synchronous>, transform_indices = @transform_0, window_bounds = array<i64: 16, 16>}, {transform_indices = @transform_1, window_bounds = array<i64: 1, 16, 128>}, {transform_indices = @transform_2, window_bounds = array<i64: 1, 16, 128>}]} {
    %c0 = arith.constant 0 : index
    %c0_0 = arith.constant 0 : index
    %0 = vector.load %arg2[%c0, %c0_0] : memref<16x16xf32, #tpu.memory_space<vmem>>, vector<16x16xf32>
    %c0_1 = arith.constant 0 : index
    %c0_2 = arith.constant 0 : index
    %c0_3 = arith.constant 0 : index
    %1 = vector.load %arg3[%c0_1, %c0_2, %c0_3] : memref<1x16x128xf32, #tpu.memory_space<vmem>>, vector<1x16x128xf32>
    %2 = vector.shape_cast %1 : vector<1x16x128xf32> to vector<16x128xf32>
    %cst = arith.constant dense<0.000000e+00> : vector<16x128xf32>
    %3 = tpu.matmul %0, %2, %cst {dimension_numbers = #tpu.dot_dimension_numbers<[1], [0], [0], [1], [0, 0, 1, 1], [], []>, precision = #tpu.contract_precision<fp32>} : vector<16x16xf32>, vector<16x128xf32>, vector<16x128xf32> -> vector<16x128xf32>
    %cst_4 = arith.constant 2.000000e-01 : f32
    %4 = vector.broadcast %cst_4 : f32 to vector<16x128xf32>
    %5 = arith.mulf %3, %4 : vector<16x128xf32>
    %c0_5 = arith.constant 0 : index
    %c0_6 = arith.constant 0 : index
    %c0_7 = arith.constant 0 : index
    %6 = vector.load %arg4[%c0_5, %c0_6, %c0_7] : memref<1x16x128xf32, #tpu.memory_space<vmem>>, vector<1x16x128xf32>
    %7 = vector.shape_cast %6 : vector<1x16x128xf32> to vector<16x128xf32>
    %8 = vector.shape_cast %5 : vector<16x128xf32> to vector<1x16x128xf32>
    tpu.vector_store %arg4[%c0_5, %c0_6, %c0_7], %8 {strides = array<i32>} : memref<1x16x128xf32, #tpu.memory_space<vmem>>, vector<1x16x128xf32>,
    return
  }
  func.func @transform_0(%arg0: i32, %arg1: i32) -> (i32, i32) {
    %c0_i32 = arith.constant 0 : i32
    %c0_i32_0 = arith.constant 0 : i32
    %c0_i32_1 = arith.constant 0 : i32
    return %c0_i32, %c0_i32_0 : i32, i32
  }
  func.func @transform_1(%arg0: i32, %arg1: i32) -> (i32, i32, i32) {
    %c0_i32 = arith.constant 0 : i32
    %c0_i32_0 = arith.constant 0 : i32
    return %arg0, %c0_i32, %arg1 : i32, i32, i32
  }
  func.func @transform_2(%arg0: i32, %arg1: i32) -> (i32, i32, i32) {
    %c0_i32 = arith.constant 0 : i32
    %c0_i32_0 = arith.constant 0 : i32
    return %arg0, %c0_i32, %arg1 : i32, i32, i32
  }
}

</mosaic_0001>

<bundles_post_ra>
// kernel: tpu_custom_call.1
= control target key start
LH: loop header
LB: loop body
LE: loop exit
PB: predicated region body
PF: predicated region fallthrough
CT: control target
= control target key end

     0   :  { %7 = vsyncpa [#allocation3], 0  ;;  %s817_s0 = inlined_call_operand.hbm [shape: f32[16,16], index: 0, kind: input, shape index: {}]   ;;  %s818_s1 = inlined_call_operand.hbm [shape: f32[1,16,128], index: 1, kind: input, shape index: {}]   ;;  %s819_s2 = inlined_call_operand.hbm [shape: f32[1,16,128], index: 2, kind: output, shape index: {}]  }
   0x1   :  { %8 = vsyncpa [#allocation6], 0 }
   0x2   :  { %9 = vsyncpa [#allocation4], 0  ;;  %s752_s9 = smov [#allocation2]   ;;  %s680_s13 = scalar_lea.hbm %s817_s0, 256 }
   0x3   :  { %s15_s10 = sshll.u32 %s752_s9, 4  ;;  %p681_p0 = scmp.ne.s32.totalorder %s817_s0, %s680_s13  ;;  %s16_s10 = int_to_ptr.vmem [resolvable:$true] %s15_s10 }
   0x4   :  { %p684_p1 = scmp.lt.u32.totalorder %s680_s13, %s817_s0 }
   0x6   :  { %p686_p2 = pnand %p684_p1, %p681_p0 }
   0x8   :  { %689 = shalt.err (!%p686_p2)
}
   0x9   :  { %s690_s18 = scalar_lea.vmem %s16_s10, 256  ;;  %p695_p4 = scmp.lt.s32.totalorder %s16_s10, %s16_s10 }
   0xa   :  { %p691_p3 = scmp.ne.s32.totalorder %s16_s10, %s690_s18  ;;  %p696_p5 = scmp.lt.s32.totalorder %s690_s18, %s690_s18 }
   0xc   :  { %p697_p6 = por %p696_p5, %p695_p4 }
   0xe   :  { %p698_p7 = pnand %p697_p6, %p691_p3 }
  0x10   :  { %701 = shalt.err (!%p698_p7)
}
  0x11   :  { %s753_s19 = smov 128   ;;  %s754_s20 = smov 8  }
  0x12   :  { %21 = dma.hbm_to_vmem [thread:$0]  %s817_s0, 256, %s16_s10, [#allocation3], %s753_s19, %s753_s19, %s754_s20  }
  0x13   :  { %s755_s23 = smov [#allocation5]   ;;  %s702_s27 = scalar_lea.hbm %s818_s1, 256 }
  0x14   :  { %s27_s24 = sshll.u32 %s755_s23, 4  ;;  %p703_p8 = scmp.ne.s32.totalorder %s818_s1, %s702_s27  ;;  %s28_s24 = int_to_ptr.vmem [resolvable:$true] %s27_s24 }
  0x15   :  { %p706_p9 = scmp.lt.u32.totalorder %s702_s27, %s818_s1 }
  0x17   :  { %p708_p10 = pnand %p706_p9, %p703_p8 }
  0x19   :  { %711 = shalt.err (!%p708_p10)
}
  0x1a   :  { %s712_s4 = scalar_lea.vmem %s28_s24, 256  ;;  %p717_p12 = scmp.lt.s32.totalorder %s28_s24, %s28_s24 }
  0x1b   :  { %p713_p11 = scmp.ne.s32.totalorder %s28_s24, %s712_s4  ;;  %p718_p13 = scmp.lt.s32.totalorder %s712_s4, %s712_s4 }
  0x1d   :  { %p719_p0 = por %p718_p13, %p717_p12 }
  0x1f   :  { %p720_p1 = pnand %p719_p0, %p713_p11 }
  0x21   :  { %723 = shalt.err (!%p720_p1)
}
  0x22   :  { %33 = dma.hbm_to_vmem [thread:$0]  %s818_s1, 256, %s28_s24, [#allocation6], %s753_s19, %s753_s19, %s754_s20  }
  0x23   :  { %746 = dma.done.wait [#allocation3], 256  }
  0x24   :  { %747 = vsyncadd [#allocation3], 4294967040 }
  0x25   :  { %748 = dma.done.wait [#allocation6], 256  }
  0x26   :  { %749 = vsyncadd [#allocation6], 4294967040  ;;  %vm44_vm0 = vcmask 130048   ;;  %v42_v0 = vld [vmem:[#allocation5] sm:$0xff]  ;;  %v43_v1 = vld [vmem:[#allocation5 + $0x8] sm:$0xff]  ;;  %s756_s1 = smov [#allocation7]  }
  0x27   :  { %v40_v2 = vld [vmem:[#allocation2] sm:$0xff]  ;;  %v52_v3 = vand.u32 4294901760, %v42_v0  ;;  %v55_v4 = vand.u32 4294901760, %v43_v1  ;;  %v41_v5 = vld [vmem:[#allocation2 + $0x8] sm:$0xff]  ;;  %s562_s6 = sshll.u32 %s756_s1, 4  ;;  %s563_s6 = int_to_ptr.vmem [resolvable:$true] %s562_s6 }
  0x28   :  { %v46_v6 = vsel %vm44_vm0, %v40_v2, 0  ;;  %v49_v7 = vsel %vm44_vm0, %v41_v5, 0  ;;  %s724_s7 = scalar_lea.vmem %s563_s6, 256  ;;  %p729_p3 = scmp.lt.s32.totalorder %s563_s6, %s563_s6 }
  0x29   :  { %v118_v8 = vand.u32 4294901760, %v46_v6  ;;  %v641_v9 = vpack.c.bf16 %v55_v4, %v52_v3  ;;  %v128_v10 = vand.u32 4294901760, %v49_v7  ;;  %v140_v11 = vsub.f32 %v42_v0, %v52_v3  ;;  %p725_p2 = scmp.ne.s32.totalorder %s563_s6, %s724_s7  ;;  %p730_p4 = scmp.lt.s32.totalorder %s724_s7, %s724_s7 }
  0x2a   :  { %v147_v12 = vsub.f32 %v43_v1, %v55_v4 }
  0x2b   :  { %v119_v13 = vsub.f32 %v46_v6, %v118_v8  ;;  %654 = vmatprep.subr.bf16.mxu0 %v641_v9  ;;  %642 = vmatprep.subr.bf16.mxu1 %v641_v9  ;;  %v129_v14 = vsub.f32 %v49_v7, %v128_v10  ;;  %v141_v15 = vand.u32 4294901760, %v140_v11  ;;  %p731_p5 = por %p730_p4, %p729_p3 }
  0x2c   :  { %v148_v16 = vand.u32 4294901760, %v147_v12  ;;  %656 = vmatpush3.bf16.msra.mxu0 %v641_v9  ;;  %644 = vmatpush3.bf16.msra.mxu1 %v641_v9  ;;  %v649_v29 = vpack.c.bf16 %v147_v12, %v140_v11 }
  0x2d   :  { %v120_v17 = vand.u32 4294901760, %v119_v13  ;;  %v130_v18 = vand.u32 4294901760, %v129_v14  ;;  %v142_v19 = vsub.f32 %v140_v11, %v141_v15  ;;  %p732_p6 = pnand %p731_p5, %p725_p2 }
  0x2e   :  { %v149_v20 = vsub.f32 %v147_v12, %v148_v16  ;;  %v657_v21 = vpack.c.bf16 %v148_v16, %v141_v15 }
  0x2f   :  { %624 = vmatprep.mubr.f32.mxu0 %v120_v17  ;;  %v121_v22 = vsub.f32 %v119_v13, %v120_v17  ;;  %v131_v23 = vsub.f32 %v129_v14, %v130_v18  ;;  %v143_v24 = vand.u32 4294901760, %v142_v19 }
  0x30   :  { %625 = vmatmul.mubr.f32.vlgmr.msra.gmra.mrb[0].mxu0 %v130_v18  ;;  %v150_v25 = vand.u32 4294901760, %v149_v20  ;;  %658 = vmatprep.subr.bf16.mxu0 %v657_v21 }
  0x31   :  { %v122_v26 = vand.u32 4294901760, %v121_v22  ;;  %660 = vmatpush3.bf16.msra.mxu0 %v657_v21  ;;  %631 = vmatprep.mubr.f32.mxu0 %v118_v8  ;;  %v132_v27 = vand.u32 4294901760, %v131_v23 }
  0x32   :  { %v645_v28 = vpack.c.bf16 %v150_v25, %v143_v24  ;;  %662 = vmatprep.subr.bf16.mxu0 %v641_v9 }
  0x33   :  { %603 = vmatprep.mubr.f32.mxu1 %v122_v26 }
  0x34   :  { %604 = vmatmul.mubr.f32.vlgmr.msra.gmra.mrb[0].mxu1 %v132_v27  ;;  %646 = vmatprep.subr.bf16.mxu1 %v645_v28 }
  0x35   :  { %648 = vmatpush3.bf16.msra.mxu1 %v645_v28  ;;  %610 = vmatprep.mubr.f32.mxu1 %v118_v8 }
  0x36   :  { %650 = vmatprep.subr.bf16.mxu1 %v649_v29 }
  0x38   :  { %632 = vmatmul.mubr.f32.vlgmr.msra.gmra.mrb[0].mxu0 %v128_v10 }
  0x39   :  { %664 = vmatpush3.bf16.msra.mxu0 %v641_v9  ;;  %638 = vmatprep.mubr.f32.mxu0 %v118_v8 }
  0x3c   :  { %611 = vmatmul.mubr.f32.vlgmr.msra.gmra.mrb[0].mxu1 %v128_v10 }
  0x3d   :  { %652 = vmatpush3.bf16.msra.mxu1 %v649_v29  ;;  %617 = vmatprep.mubr.f32.mxu1 %v119_v13 }
  0x40   :  { %639 = vmatmul.mubr.f32.vlgmr.msra.gmra.mrb[0].mxu0 %v128_v10 }
  0x44   :  { %618 = vmatmul.mubr.f32.vlgmr.msra.gmra.mrb[0].mxu1 %v129_v14 }
 0x113   :  { %v640_v30 = vpop.f32.mrb[0].mxu0 }
 0x114   :  { %v543_v31 = vpop.f32.mrb[1].mxu0 }
 0x117   :  { %v619_v32 = vpop.f32.mrb[0].mxu1 }
 0x118   :  { %v665_v33 = vadd.f32 %v640_v30, %v619_v32  ;;  %v297_v34 = vpop.f32.mrb[1].mxu1 }
 0x119   :  { %v666_v35 = vadd.f32 %v543_v31, %v297_v34 }
 0x11a   :  { %v554_v36 = vmul.f32 0.2, %v665_v33 }
 0x11b   :  { %v553_v37 = vmul.f32 0.2, %v666_v35 }
 0x11c   :  { %556 = vst [vmem:[#allocation7 + $0x8] sm:$0xff] %v554_v36 }
 0x11d   :  { %555 = vst [vmem:[#allocation7] sm:$0xff] %v553_v37 }
 0x11e   :  { %735 = shalt.err (!%p732_p6)
}
 0x11f   :  { %s736_s10 = scalar_lea.hbm %s819_s2, 256 }
 0x120   :  { %p737_p7 = scmp.ne.s32.totalorder %s819_s2, %s736_s10  ;;  %p740_p8 = scmp.lt.u32.totalorder %s736_s10, %s819_s2 }
 0x122   :  { %p742_p9 = pnand %p740_p8, %p737_p7 }
 0x124   :  { %745 = shalt.err (!%p742_p9)
}
 0x125   :  { %568 = dma.vmem_to_hbm [thread:$0]  %s563_s6, 256, %s819_s2, [#allocation4], %s753_s19, %s753_s19, %s754_s20  }
 0x126   :  { %750 = dma.done.wait [#allocation4], 256  }
 0x127   :  { %751 = vsyncadd [#allocation4], 4294967040 }
 0x128   :  { %572 = vsyncpa [#allocation3], 1 }
 0x129   :  { %573 = vsyncpa [#allocation6], 1 }
 0x12a   :  { %574 = vsyncpa [#allocation4], 1 }

</bundles_post_ra>
